<compile_context>
chip_gen: v7x
topology: tpu7x:2x2x1
jax: 0.10.0
libtpu: 0.0.40
codegen_flags: <defaults>
</compile_context>

<pallas_src>
import functools

import jax
import jax.numpy as jnp
from jax.experimental import pallas as pl
from jax.experimental.pallas import tpu as pltpu

BACKBONE_C = 1280   # efficientnet_b0 final feature channels
EMBED_DIM = 128     # embedding_dim (lane-friendly: exactly one vreg lane span)
LN_EPS = 1e-5       # nn.LayerNorm default eps


def _encoder_kernel(x_ref, w1_ref, b1_ref, gamma_ref, beta_ref, w2_ref, b2_ref,
                    feat_ref, hid_ref, acc_ref, *, s_total, mask_s):
    # Grid: (batch tiles [parallel], spatial tiles [arbitrary reduction]).
    s = pl.program_id(1)
    ns = pl.num_programs(1)

    @pl.when(s == 0)
    def _():
        acc_ref[...] = jnp.zeros_like(acc_ref)

    # x block: (TB, TS, C) — accumulate the spatial sum in f32.
    x = x_ref[...].astype(jnp.float32)
    if mask_s:
        # Partial final spatial tile: zero padded rows so the sum (and the
        # division by the *true* s_total) stays exact.  Mask is (1, TS, 1)
        # and broadcasts over batch/lane dims.
        ts = x.shape[1]
        pos = jax.lax.broadcasted_iota(jnp.int32, (1, ts, 1), 1) + s * ts
        x = jnp.where(pos < s_total, x, 0.0)
    acc_ref[...] += jnp.sum(x, axis=1)

    @pl.when(s == ns - 1)
    def _():
        # AdaptiveAvgPool2d(1) + x.view(B, -1)
        pooled = acc_ref[...] * (1.0 / float(s_total))          # (TB, 1280)

        # feature_layers: Linear(1280, E) -> ReLU -> Dropout (eval: identity)
        #                 -> LayerNorm(E)
        h = jnp.dot(pooled, w1_ref[...],
                    preferred_element_type=jnp.float32) + b1_ref[...]
        h = jnp.maximum(h, 0.0)
        mu = jnp.mean(h, axis=-1, keepdims=True)
        var = jnp.mean(h * h, axis=-1, keepdims=True) - mu * mu  # fused stats
        feat = (h - mu) * jax.lax.rsqrt(var + LN_EPS)
        feat = feat * gamma_ref[...] + beta_ref[...]
        feat_ref[...] = feat

        # hidden_projection: Linear(E, E)
        hid_ref[...] = jnp.dot(feat, w2_ref[...],
                               preferred_element_type=jnp.float32) + b2_ref[...]


def _pick_tiles(B, S, C, itemsize, budget_bytes=8 << 20):
    """Pick (TB, TS) so one x block stays under ~8 MiB (double-buffering then
    stays well inside scoped VMEM on v5e/v6e/v7x). Respects the (8,128) rule:
    TS is either the full spatial extent or a multiple of 8; C=1280 is a
    multiple of 128."""
    tb = min(B, 8)
    while tb * 2 <= B and B % (tb * 2) == 0 and (tb * 2) * S * C * itemsize <= budget_bytes:
        tb *= 2
    ts = S
    while tb * ts * C * itemsize > budget_bytes and ts > 8:
        ts = max(8, ((ts // 2 + 7) // 8) * 8)   # halve, keep multiple of 8
    return tb, min(ts, S)


def image_encoder_forward(feature_map_nhwc, params):
    """feature_map_nhwc: (B, Hf, Wf, 1280) f32/bf16 — efficientnet_b0 pre-pool features."""
    B, Hf, Wf, C = feature_map_nhwc.shape
    assert C == BACKBONE_C
    S = Hf * Wf
    E = params["w1"].shape[1]

    # Channels already minor-most: this reshape is free (no HBM round-trip).
    x = feature_map_nhwc.reshape(B, S, C)

    itemsize = jnp.dtype(x.dtype).itemsize
    TB, TS = _pick_tiles(B, S, C, itemsize)
    nb = pl.cdiv(B, TB)
    ns = pl.cdiv(S, TS)
    mask_s = (S % TS) != 0

    kernel = functools.partial(_encoder_kernel, s_total=S, mask_s=mask_s)

    cost = pl.CostEstimate(
        flops=2 * B * (C * E + E * E) + B * S * C,
        transcendentals=B,
        bytes_accessed=(B * S * C * itemsize
                        + (C * E + E * E + 4 * E) * 4
                        + 2 * B * E * 4),
    )

    feat, hid = pl.pallas_call(
        kernel,
        grid=(nb, ns),
        in_specs=[
            pl.BlockSpec((TB, TS, C), lambda b, s: (b, s, 0)),   # x (tiled)
            pl.BlockSpec((C, E), lambda b, s: (0, 0)),           # w1 (resident)
            pl.BlockSpec((1, E), lambda b, s: (0, 0)),           # b1
            pl.BlockSpec((1, E), lambda b, s: (0, 0)),           # LayerNorm gamma
            pl.BlockSpec((1, E), lambda b, s: (0, 0)),           # LayerNorm beta
            pl.BlockSpec((E, E), lambda b, s: (0, 0)),           # w2 (resident)
            pl.BlockSpec((1, E), lambda b, s: (0, 0)),           # b2
        ],
        out_specs=[
            pl.BlockSpec((TB, E), lambda b, s: (b, 0)),          # features
            pl.BlockSpec((TB, E), lambda b, s: (b, 0)),          # hidden (pre-repeat)
        ],
        out_shape=[
            jax.ShapeDtypeStruct((B, E), jnp.float32),
            jax.ShapeDtypeStruct((B, E), jnp.float32),
        ],
        scratch_shapes=[pltpu.VMEM((TB, C), jnp.float32)],       # pooled-sum accumulator
        compiler_params=pltpu.CompilerParams(
            dimension_semantics=("parallel", "arbitrary"),
            vmem_limit_bytes=32 * 1024 * 1024,
        ),
        cost_estimate=cost,
    )(x, params["w1"], params["b1"], params["gamma"], params["beta"],
      params["w2"], params["b2"])

    # hidden.unsqueeze(0).repeat(4, 1, 1) -> (4, B, E)
    hidden = jnp.broadcast_to(hid[None, :, :], (4, B, E))
    return feat, hidden


def init_params(key, embedding_dim=EMBED_DIM):
    """Deterministic synthetic init mimicking nn.Linear defaults (uniform +-1/sqrt(fan_in))."""
    k1, k2, k3, k4 = jax.random.split(key, 4)
    s1 = 1.0 / jnp.sqrt(BACKBONE_C)
    s2 = 1.0 / jnp.sqrt(embedding_dim)
    return {
        "w1": jax.random.uniform(k1, (BACKBONE_C, embedding_dim), jnp.float32, -s1, s1),
        "b1": jax.random.uniform(k2, (1, embedding_dim), jnp.float32, -s1, s1),
        "gamma": jnp.ones((1, embedding_dim), jnp.float32),
        "beta": jnp.zeros((1, embedding_dim), jnp.float32),
        "w2": jax.random.uniform(k3, (embedding_dim, embedding_dim), jnp.float32, -s2, s2),
        "b2": jax.random.uniform(k4, (1, embedding_dim), jnp.float32, -s2, s2),
    }


def _reference(feature_map_nhwc, params):
    """Pure-JAX reference of the same forward (eval mode)."""
    B = feature_map_nhwc.shape[0]
    x = feature_map_nhwc.reshape(B, -1, BACKBONE_C).astype(jnp.float32)
    pooled = jnp.mean(x, axis=1)
    h = pooled @ params["w1"] + params["b1"]
    h = jnp.maximum(h, 0.0)
    mu = jnp.mean(h, axis=-1, keepdims=True)
    var = jnp.mean(jnp.square(h - mu), axis=-1, keepdims=True)
    feat = (h - mu) * jax.lax.rsqrt(var + LN_EPS) * params["gamma"] + params["beta"]
    hid = feat @ params["w2"] + params["b2"]
    return feat, jnp.broadcast_to(hid[None], (4, B, hid.shape[-1]))


if __name__ == "__main__":
    key = jax.random.PRNGKey(0)
    k_x, k_p = jax.random.split(key)

    # Small, deterministic example: B=2, backbone feature map 4 x 4 x 1280
    # (what efficientnet_b0 emits for a 128x128 image, pre-avgpool),
    # fed in bfloat16 to halve HBM traffic on the only large input.
    B, Hf, Wf = 2, 4, 4
    feature_map = jax.random.normal(
        k_x, (B, Hf, Wf, BACKBONE_C), jnp.float32).astype(jnp.bfloat16)
    params = init_params(k_p)

    features, hidden = jax.jit(image_encoder_forward)(feature_map, params)
    jax.block_until_ready((features, hidden))

    assert features.shape == (B, EMBED_DIM)
    assert hidden.shape == (4, B, EMBED_DIM)

    ref_feat, ref_hid = _reference(feature_map, params)
    assert jnp.allclose(features, ref_feat, atol=2e-3, rtol=2e-3)
    assert jnp.allclose(hidden, ref_hid, atol=2e-3, rtol=2e-3)

    print("KERNEL_OK")
</pallas_src>

<mosaic_0001>
module attributes {stable_mosaic.version = 11 : i64} {
  func.func @_encoder_kernel(%arg0: i32, %arg1: i32, %arg2: memref<2x16x1280xbf16, #tpu.memory_space<vmem>>, %arg3: memref<1280x128xf32, #tpu.memory_space<vmem>>, %arg4: memref<1x128xf32, #tpu.memory_space<vmem>>, %arg5: memref<1x128xf32, #tpu.memory_space<vmem>>, %arg6: memref<1x128xf32, #tpu.memory_space<vmem>>, %arg7: memref<128x128xf32, #tpu.memory_space<vmem>>, %arg8: memref<1x128xf32, #tpu.memory_space<vmem>>, %arg9: memref<2x128xf32, #tpu.memory_space<vmem>>, %arg10: memref<2x128xf32, #tpu.memory_space<vmem>>, %arg11: memref<2x1280xf32, #tpu.memory_space<vmem>>) attributes {dimension_semantics = [#tpu.dimension_semantics<parallel>, #tpu.dimension_semantics<arbitrary>], iteration_bounds = array<i64: 1, 1>, scalar_prefetch = 0 : i64, scratch_operands = 1 : i64, tpu.core_type = #tpu.core_type<tc>, window_params = [{transform_indices = @transform_0, window_bounds = array<i64: 2, 16, 1280>}, {pipeline_mode = #tpu.pipeline_mode<synchronous>, transform_indices = @transform_1, window_bounds = array<i64: 1280, 128>}, {pipeline_mode = #tpu.pipeline_mode<synchronous>, transform_indices = @transform_2, window_bounds = array<i64: 1, 128>}, {pipeline_mode = #tpu.pipeline_mode<synchronous>, transform_indices = @transform_3, window_bounds = array<i64: 1, 128>}, {pipeline_mode = #tpu.pipeline_mode<synchronous>, transform_indices = @transform_4, window_bounds = array<i64: 1, 128>}, {pipeline_mode = #tpu.pipeline_mode<synchronous>, transform_indices = @transform_5, window_bounds = array<i64: 128, 128>}, {pipeline_mode = #tpu.pipeline_mode<synchronous>, transform_indices = @transform_6, window_bounds = array<i64: 1, 128>}, {transform_indices = @transform_7, window_bounds = array<i64: 2, 128>}, {transform_indices = @transform_8, window_bounds = array<i64: 2, 128>}]} {
    %c0_i32 = arith.constant 0 : i32
    %0 = arith.cmpi eq, %arg1, %c0_i32 : i32
    %1 = arith.extui %0 : i1 to i32
    %c0_i32_0 = arith.constant 0 : i32
    %2 = arith.cmpi ne, %1, %c0_i32_0 : i32
    scf.if %2 {
      %cst_9 = arith.constant 0.000000e+00 : f32
      %12 = vector.broadcast %cst_9 : f32 to vector<2x1280xf32>
      %c0_10 = arith.constant 0 : index
      %c0_11 = arith.constant 0 : index
      %13 = vector.load %arg11[%c0_10, %c0_11] : memref<2x1280xf32, #tpu.memory_space<vmem>>, vector<2x1280xf32>
      tpu.vector_store %arg11[%c0_10, %c0_11], %12 {strides = array<i32>} : memref<2x1280xf32, #tpu.memory_space<vmem>>, vector<2x1280xf32>,
    } else {
    }
    %c0 = arith.constant 0 : index
    %c0_1 = arith.constant 0 : index
    %c0_2 = arith.constant 0 : index
    %3 = vector.load %arg2[%c0, %c0_1, %c0_2] : memref<2x16x1280xbf16, #tpu.memory_space<vmem>>, vector<2x16x1280xbf16>
    %4 = arith.extf %3 : vector<2x16x1280xbf16> to vector<2x16x1280xf32>
    %c0_3 = arith.constant 0 : index
    %c0_4 = arith.constant 0 : index
    %5 = vector.load %arg11[%c0_3, %c0_4] : memref<2x1280xf32, #tpu.memory_space<vmem>>, vector<2x1280xf32>
    %cst = arith.constant dense<0.000000e+00> : vector<2x1280xf32>
    %6 = vector.multi_reduction <add>, %4, %cst [1] : vector<2x16x1280xf32> to vector<2x1280xf32>
    %7 = arith.addf %5, %6 : vector<2x1280xf32>
    %c0_5 = arith.constant 0 : index
    %c0_6 = arith.constant 0 : index
    %8 = vector.load %arg11[%c0_5, %c0_6] : memref<2x1280xf32, #tpu.memory_space<vmem>>, vector<2x1280xf32>
    tpu.vector_store %arg11[%c0_5, %c0_6], %7 {strides = array<i32>} : memref<2x1280xf32, #tpu.memory_space<vmem>>, vector<2x1280xf32>,
    %c0_i32_7 = arith.constant 0 : i32
    %9 = arith.cmpi eq, %arg1, %c0_i32_7 : i32
    %10 = arith.extui %9 : i1 to i32
    %c0_i32_8 = arith.constant 0 : i32
    %11 = arith.cmpi ne, %10, %c0_i32_8 : i32
    scf.if %11 {
      %c0_9 = arith.constant 0 : index
      %c0_10 = arith.constant 0 : index
      %12 = vector.load %arg11[%c0_9, %c0_10] : memref<2x1280xf32, #tpu.memory_space<vmem>>, vector<2x1280xf32>
      %cst_11 = arith.constant 6.250000e-02 : f32
      %13 = vector.broadcast %cst_11 : f32 to vector<2x1280xf32>
      %14 = arith.mulf %12, %13 : vector<2x1280xf32>
      %c0_12 = arith.constant 0 : index
      %c0_13 = arith.constant 0 : index
      %15 = vector.load %arg3[%c0_12, %c0_13] : memref<1280x128xf32, #tpu.memory_space<vmem>>, vector<1280x128xf32>
      %cst_14 = arith.constant dense<0.000000e+00> : vector<2x128xf32>
      %16 = tpu.matmul %14, %15, %cst_14 {dimension_numbers = #tpu.dot_dimension_numbers<[1], [0], [0], [1], [0, 0, 1, 1], [], []>} : vector<2x1280xf32>, vector<1280x128xf32>, vector<2x128xf32> -> vector<2x128xf32>
      %c0_15 = arith.constant 0 : index
      %c0_16 = arith.constant 0 : index
      %17 = vector.load %arg4[%c0_15, %c0_16] : memref<1x128xf32, #tpu.memory_space<vmem>>, vector<1x128xf32>
      %18 = vector.broadcast %17 : vector<1x128xf32> to vector<2x128xf32>
      %19 = arith.addf %16, %18 : vector<2x128xf32>
      %cst_17 = arith.constant 0.000000e+00 : f32
      %20 = vector.broadcast %cst_17 : f32 to vector<2x128xf32>
      %21 = arith.maximumf %19, %20 : vector<2x128xf32>
      %cst_18 = arith.constant dense<0.000000e+00> : vector<2xf32>
      %22 = vector.multi_reduction <add>, %21, %cst_18 [1] : vector<2x128xf32> to vector<2xf32>
      %23 = vector.shape_cast %22 : vector<2xf32> to vector<2x1xf32>
      %cst_19 = arith.constant 1.280000e+02 : f32
      %24 = vector.broadcast %cst_19 : f32 to vector<2x1xf32>
      %25 = arith.divf %23, %24 : vector<2x1xf32>
      %26 = arith.mulf %21, %21 : vector<2x128xf32>
      %cst_20 = arith.constant dense<0.000000e+00> : vector<2xf32>
      %27 = vector.multi_reduction <add>, %26, %cst_20 [1] : vector<2x128xf32> to vector<2xf32>
      %28 = vector.shape_cast %27 : vector<2xf32> to vector<2x1xf32>
      %cst_21 = arith.constant 1.280000e+02 : f32
      %29 = vector.broadcast %cst_21 : f32 to vector<2x1xf32>
      %30 = arith.divf %28, %29 : vector<2x1xf32>
      %31 = arith.mulf %25, %25 : vector<2x1xf32>
      %32 = arith.subf %30, %31 : vector<2x1xf32>
      %33 = vector.broadcast %25 : vector<2x1xf32> to vector<2x128xf32>
      %34 = arith.subf %21, %33 : vector<2x128xf32>
      %cst_22 = arith.constant 9.99999974E-6 : f32
      %35 = vector.broadcast %cst_22 : f32 to vector<2x1xf32>
      %36 = arith.addf %32, %35 : vector<2x1xf32>
      %37 = math.rsqrt %36 : vector<2x1xf32>
      %38 = vector.broadcast %37 : vector<2x1xf32> to vector<2x128xf32>
      %39 = arith.mulf %34, %38 : vector<2x128xf32>
      %c0_23 = arith.constant 0 : index
      %c0_24 = arith.constant 0 : index
      %40 = vector.load %arg5[%c0_23, %c0_24] : memref<1x128xf32, #tpu.memory_space<vmem>>, vector<1x128xf32>
      %41 = vector.broadcast %40 : vector<1x128xf32> to vector<2x128xf32>
      %42 = arith.mulf %39, %41 : vector<2x128xf32>
      %c0_25 = arith.constant 0 : index
      %c0_26 = arith.constant 0 : index
      %43 = vector.load %arg6[%c0_25, %c0_26] : memref<1x128xf32, #tpu.memory_space<vmem>>, vector<1x128xf32>
      %44 = vector.broadcast %43 : vector<1x128xf32> to vector<2x128xf32>
      %45 = arith.addf %42, %44 : vector<2x128xf32>
      %c0_27 = arith.constant 0 : index
      %c0_28 = arith.constant 0 : index
      %46 = vector.load %arg9[%c0_27, %c0_28] : memref<2x128xf32, #tpu.memory_space<vmem>>, vector<2x128xf32>
      tpu.vector_store %arg9[%c0_27, %c0_28], %45 {strides = array<i32>} : memref<2x128xf32, #tpu.memory_space<vmem>>, vector<2x128xf32>,
      %c0_29 = arith.constant 0 : index
      %c0_30 = arith.constant 0 : index
      %47 = vector.load %arg7[%c0_29, %c0_30] : memref<128x128xf32, #tpu.memory_space<vmem>>, vector<128x128xf32>
      %cst_31 = arith.constant dense<0.000000e+00> : vector<2x128xf32>
      %48 = tpu.matmul %45, %47, %cst_31 {dimension_numbers = #tpu.dot_dimension_numbers<[1], [0], [0], [1], [0, 0, 1, 1], [], []>} : vector<2x128xf32>, vector<128x128xf32>, vector<2x128xf32> -> vector<2x128xf32>
      %c0_32 = arith.constant 0 : index
      %c0_33 = arith.constant 0 : index
      %49 = vector.load %arg8[%c0_32, %c0_33] : memref<1x128xf32, #tpu.memory_space<vmem>>, vector<1x128xf32>
      %50 = vector.broadcast %49 : vector<1x128xf32> to vector<2x128xf32>
      %51 = arith.addf %48, %50 : vector<2x128xf32>
      %c0_34 = arith.constant 0 : index
      %c0_35 = arith.constant 0 : index
      %52 = vector.load %arg10[%c0_34, %c0_35] : memref<2x128xf32, #tpu.memory_space<vmem>>, vector<2x128xf32>
      tpu.vector_store %arg10[%c0_34, %c0_35], %51 {strides = array<i32>} : memref<2x128xf32, #tpu.memory_space<vmem>>, vector<2x128xf32>,
    } else {
    }
    return
  }
  func.func @transform_0(%arg0: i32, %arg1: i32) -> (i32, i32, i32) {
    %c0_i32 = arith.constant 0 : i32
    %c0_i32_0 = arith.constant 0 : i32
    return %arg0, %arg1, %c0_i32 : i32, i32, i32
  }
  func.func @transform_1(%arg0: i32, %arg1: i32) -> (i32, i32) {
    %c0_i32 = arith.constant 0 : i32
    %c0_i32_0 = arith.constant 0 : i32
    %c0_i32_1 = arith.constant 0 : i32
    return %c0_i32, %c0_i32_0 : i32, i32
  }
  func.func @transform_2(%arg0: i32, %arg1: i32) -> (i32, i32) {
    %c0_i32 = arith.constant 0 : i32
    %c0_i32_0 = arith.constant 0 : i32
    %c0_i32_1 = arith.constant 0 : i32
    return %c0_i32, %c0_i32_0 : i32, i32
  }
  func.func @transform_3(%arg0: i32, %arg1: i32) -> (i32, i32) {
    %c0_i32 = arith.constant 0 : i32
    %c0_i32_0 = arith.constant 0 : i32
    %c0_i32_1 = arith.constant 0 : i32
    return %c0_i32, %c0_i32_0 : i32, i32
  }
  func.func @transform_4(%arg0: i32, %arg1: i32) -> (i32, i32) {
    %c0_i32 = arith.constant 0 : i32
    %c0_i32_0 = arith.constant 0 : i32
    %c0_i32_1 = arith.constant 0 : i32
    return %c0_i32, %c0_i32_0 : i32, i32
  }
  func.func @transform_5(%arg0: i32, %arg1: i32) -> (i32, i32) {
    %c0_i32 = arith.constant 0 : i32
    %c0_i32_0 = arith.constant 0 : i32
    %c0_i32_1 = arith.constant 0 : i32
    return %c0_i32, %c0_i32_0 : i32, i32
  }
  func.func @transform_6(%arg0: i32, %arg1: i32) -> (i32, i32) {
    %c0_i32 = arith.constant 0 : i32
    %c0_i32_0 = arith.constant 0 : i32
    %c0_i32_1 = arith.constant 0 : i32
    return %c0_i32, %c0_i32_0 : i32, i32
  }
  func.func @transform_7(%arg0: i32, %arg1: i32) -> (i32, i32) {
    %c0_i32 = arith.constant 0 : i32
    %c0_i32_0 = arith.constant 0 : i32
    return %arg0, %c0_i32 : i32, i32
  }
  func.func @transform_8(%arg0: i32, %arg1: i32) -> (i32, i32) {
    %c0_i32 = arith.constant 0 : i32
    %c0_i32_0 = arith.constant 0 : i32
    return %arg0, %c0_i32 : i32, i32
  }
}

</mosaic_0001>

<bundles_post_ra>
// kernel: image_encoder_forward.1
= control target key start
LH: loop header
LB: loop body
LE: loop exit
PB: predicated region body
PF: predicated region fallthrough
CT: control target
= control target key end

     0   :  { %14 = vsyncpa [#allocation4], 0  ;;  %s1966_s0 = inlined_call_operand.vmem [shape: bf16[2,16,1280], index: 0, kind: input, shape index: {}]   ;;  %s1967_s1 = inlined_call_operand.hbm [shape: f32[1280,128], index: 1, kind: input, shape index: {}]   ;;  %s1968_s2 = inlined_call_operand.vmem [shape: f32[1,128], index: 2, kind: input, shape index: {}]   ;;  %s1969_s3 = inlined_call_operand.vmem [shape: f32[1,128], index: 3, kind: input, shape index: {}]   ;;  %s1970_s4 = inlined_call_operand.vmem [shape: f32[1,128], index: 4, kind: input, shape index: {}]   ;;  %s1971_s5 = inlined_call_operand.vmem [shape: f32[128,128], index: 5, kind: input, shape index: {}]   ;;  %s1972_s6 = inlined_call_operand.vmem [shape: f32[1,128], index: 6, kind: input, shape index: {}]   ;;  %s1973_s7 = inlined_call_operand.hbm [shape: f32[2,128], index: 7, kind: output, shape index: {0}]   ;;  %s1974_s8 = inlined_call_operand.vmem [shape: f32[2,128], index: 8, kind: output, shape index: {1}]  }
   0x1   :  { %15 = vsyncpa [#allocation5], 0  ;;  %s1595_s27 = smov [#allocation3]   ;;  %s1547_s9 = scalar_lea.hbm %s1967_s1, 20480 }
   0x2   :  { %s23_s28 = sshll.u32 %s1595_s27, 4  ;;  %p1548_p0 = scmp.ne.s32.totalorder %s1967_s1, %s1547_s9  ;;  %s24_s28 = int_to_ptr.vmem [resolvable:$true] %s23_s28 }
   0x3   :  { %p1551_p1 = scmp.lt.u32.totalorder %s1547_s9, %s1967_s1 }
   0x5   :  { %p1553_p2 = pnand %p1551_p1, %p1548_p0 }
   0x7   :  { %1556 = shalt.err (!%p1553_p2)
}
   0x8   :  { %s1557_s14 = scalar_lea.vmem %s24_s28, 20480  ;;  %p1562_p4 = scmp.lt.s32.totalorder %s24_s28, %s24_s28 }
   0x9   :  { %p1558_p3 = scmp.ne.s32.totalorder %s24_s28, %s1557_s14  ;;  %p1563_p5 = scmp.lt.s32.totalorder %s1557_s14, %s1557_s14 }
   0xb   :  { %p1564_p6 = por %p1563_p5, %p1562_p4 }
   0xd   :  { %p1565_p7 = pnand %p1564_p6, %p1558_p3 }
   0xf   :  { %1568 = shalt.err (!%p1565_p7)
}
  0x10   :  { %s1596_s15 = smov 128   ;;  %s1597_s16 = smov 8  }
  0x11   :  { %29 = dma.hbm_to_vmem [thread:$0]  %s1967_s1, 20480, %s24_s28, [#allocation4], %s1596_s15, %s1596_s15, %s1597_s16  }
  0x12   :  { %1591 = dma.done.wait [#allocation4], 20480  }
  0x13   :  { %1592 = vsyncadd [#allocation4], 4294946816  ;;  %v1598_v0 = vmov 0.0   ;;  %v418_v1 = vld [vmem:[#allocation3 + $0x80] sm:$0xff]  ;;  %v419_v2 = vld [vmem:[#allocation3 + $0x88] sm:$0xff]  ;;  %v278_v53 = vlaneseq  ;;  %vm362_vm0 = vcmask 1041409  }
  0x14   :  { %49 = vst [vmem:[#allocation2 + $0x10] sm:$0xf] %v1598_v0  ;;  %v402_v3 = vld [vmem:[#allocation3] sm:$0xff]  ;;  %v1353_v4 = vpack.c.bf16 %v419_v2, %v418_v1  ;;  %v403_v5 = vld [vmem:[#allocation3 + $0x8] sm:$0xff]  ;;  %v420_v12 = vld [vmem:[#allocation3 + $0x90] sm:$0xff]  ;;  %vm364_vm1 = vcmask 1043459  }
  0x15   :  { %v450_v6 = vld [vmem:[#allocation3 + $0x180] sm:$0xff]  ;;  %v451_v7 = vld [vmem:[#allocation3 + $0x188] sm:$0xff]  ;;  %v1355_v8 = vpack.c.bf16 %v403_v5, %v402_v3  ;;  %v421_v14 = vld [vmem:[#allocation3 + $0x98] sm:$0xff]  ;;  %v1599_v51 = vmov 1983009808   ;;  %vm366_vm2 = vcmask 1045509  }
  0x16   :  { %v1385_v9 = vpack.c.bf16 %v451_v7, %v450_v6  ;;  %v434_v10 = vld [vmem:[#allocation3 + $0x100] sm:$0xff]  ;;  %v435_v11 = vld [vmem:[#allocation3 + $0x108] sm:$0xff]  ;;  %1354 = vmatprep.subr.bf16.mxu0 %v1353_v4  ;;  %v404_v15 = vld [vmem:[#allocation3 + $0x10] sm:$0xff]  ;;  %v1357_v17 = vpack.c.bf16 %v421_v14, %v420_v12  ;;  %v276_v52 = vunpack.c.l.s4 %v1599_v51  ;;  %vm368_vm3 = vcmask 1047559   ;;  %s1602_s22 = smov [#allocation6]  }
  0x17   :  { %v1387_v13 = vpack.c.bf16 %v435_v11, %v434_v10  ;;  %v405_v16 = vld [vmem:[#allocation3 + $0x18] sm:$0xff]  ;;  %1356 = vmatpush3.bf16.msra.mxu0 %v1355_v8  ;;  %v452_v19 = vld [vmem:[#allocation3 + $0x190] sm:$0xff]  ;;  %v422_v24 = vld [vmem:[#allocation3 + $0xa0] sm:$0xff]  ;;  %v279_v8 = vshrl.u32 %v278_v53, 7  ;;  %vm975_vm4 = vcmask 1041408   ;;  %vm1601_vm5 = vmmov 0  }
  0x18   :  { %1386 = vmatprep.subr.bf16.mxu1 %v1385_v9  ;;  %v1359_v18 = vpack.c.bf16 %v405_v16, %v404_v15  ;;  %v453_v20 = vld [vmem:[#allocation3 + $0x198] sm:$0xff]  ;;  %v436_v21 = vld [vmem:[#allocation3 + $0x110] sm:$0xff]  ;;  %v423_v25 = vld [vmem:[#allocation3 + $0xa8] sm:$0xff]  ;;  %1358 = vmatprep.subr.bf16.mxu0 %v1357_v17  ;;  %v277_v7 = vunpack.c.0.s8 %v276_v52  ;;  %s1109_s23 = sshll.u32 %s1602_s22, 4  ;;  %s1110_s23 = int_to_ptr.vmem [resolvable:$true] %s1109_s23 }
  0x19   :  { %1388 = vmatpush3.bf16.msra.mxu1 %v1387_v13  ;;  %v1389_v22 = vpack.c.bf16 %v453_v20, %v452_v19  ;;  %v437_v23 = vld [vmem:[#allocation3 + $0x118] sm:$0xff]  ;;  %v1361_v27 = vpack.c.bf16 %v423_v25, %v422_v24  ;;  %v406_v28 = vld [vmem:[#allocation3 + $0x20] sm:$0xff]  ;;  %v407_v29 = vld [vmem:[#allocation3 + $0x28] sm:$0xff]  ;;  %s1569_s24 = scalar_lea.vmem %s1110_s23, 32  ;;  %p1574_p9 = scmp.lt.s32.totalorder %s1110_s23, %s1110_s23 }
  0x1a   :  { %v1391_v26 = vpack.c.bf16 %v437_v23, %v436_v21  ;;  %v454_v30 = vld [vmem:[#allocation3 + $0x1a0] sm:$0xff]  ;;  %v455_v31 = vld [vmem:[#allocation3 + $0x1a8] sm:$0xff]  ;;  %v1363_v34 = vpack.c.bf16 %v407_v29, %v406_v28  ;;  %v424_v36 = vld [vmem:[#allocation3 + $0xb0] sm:$0xff]  ;;  %p1570_p8 = scmp.ne.s32.totalorder %s1110_s23, %s1569_s24  ;;  %p1575_p10 = scmp.lt.s32.totalorder %s1569_s24, %s1569_s24 }
  0x1b   :  { %1390 = vmatprep.subr.bf16.mxu1 %v1389_v22  ;;  %v438_v32 = vld [vmem:[#allocation3 + $0x120] sm:$0xff]  ;;  %v439_v33 = vld [vmem:[#allocation3 + $0x128] sm:$0xff]  ;;  %1360 = vmatpush3.bf16.msra.mxu0 %v1359_v18  ;;  %v1393_v35 = vpack.c.bf16 %v455_v31, %v454_v30  ;;  %v425_v37 = vld [vmem:[#allocation3 + $0xb8] sm:$0xff] }
  0x1c   :  { %v408_v38 = vld [vmem:[#allocation3 + $0x30] sm:$0xff]  ;;  %1362 = vmatprep.subr.bf16.mxu0 %v1361_v27  ;;  %v1395_v39 = vpack.c.bf16 %v439_v33, %v438_v32  ;;  %v1365_v40 = vpack.c.bf16 %v425_v37, %v424_v36  ;;  %v409_v41 = vld [vmem:[#allocation3 + $0x38] sm:$0xff]  ;;  %v426_v47 = vld [vmem:[#allocation3 + $0xc0] sm:$0xff]  ;;  %v1678_v27 = vsub.s32 %v277_v7, %v279_v8  ;;  %p1576_p11 = por %p1575_p10, %p1574_p9 }
  0x1d   :  { %1392 = vmatpush3.bf16.msra.mxu1 %v1391_v26  ;;  %v456_v42 = vld [vmem:[#allocation3 + $0x1b0] sm:$0xff]  ;;  %v457_v43 = vld [vmem:[#allocation3 + $0x1b8] sm:$0xff]  ;;  %v427_v48 = vld [vmem:[#allocation3 + $0xc8] sm:$0xff]  ;;  %v1367_v54 = vpack.c.bf16 %v409_v41, %v408_v38 }
  0x1e   :  { %1394 = vmatprep.subr.bf16.mxu1 %v1393_v35  ;;  %v1397_v44 = vpack.c.bf16 %v457_v43, %v456_v42  ;;  %v440_v45 = vld [vmem:[#allocation3 + $0x130] sm:$0xff]  ;;  %v441_v46 = vld [vmem:[#allocation3 + $0x138] sm:$0xff]  ;;  %v410_v49 = vld [vmem:[#allocation3 + $0x40] sm:$0xff]  ;;  %v1369_v59 = vpack.c.bf16 %v427_v48, %v426_v47  ;;  %p1577_p12 = pnand %p1576_p11, %p1570_p8 }
  0x1f   :  { %v411_v50 = vld [vmem:[#allocation3 + $0x48] sm:$0xff]  ;;  %1364 = vmatpush3.bf16.msra.mxu0 %v1363_v34  ;;  %v458_v55 = vld [vmem:[#allocation3 + $0x1c0] sm:$0xff]  ;;  %v1399_v58 = vpack.c.bf16 %v441_v46, %v440_v45  ;;  %v428_v61 = vld [vmem:[#allocation3 + $0xd0] sm:$0xff] }
  0x20   :  { %v459_v56 = vld [vmem:[#allocation3 + $0x1c8] sm:$0xff]  ;;  %v442_v57 = vld [vmem:[#allocation3 + $0x140] sm:$0xff]  ;;  %1366 = vmatprep.subr.bf16.mxu0 %v1365_v40  ;;  %v429_v62 = vld [vmem:[#allocation3 + $0xd8] sm:$0xff]  ;;  %v1371_v9 = vpack.c.bf16 %v411_v50, %v410_v49 }
  0x21   :  { %1396 = vmatpush3.bf16.msra.mxu1 %v1395_v39  ;;  %v443_v60 = vld [vmem:[#allocation3 + $0x148] sm:$0xff]  ;;  %v1401_v63 = vpack.c.bf16 %v459_v56, %v458_v55  ;;  %v412_v1 = vld [vmem:[#allocation3 + $0x50] sm:$0xff]  ;;  %v413_v2 = vld [vmem:[#allocation3 + $0x58] sm:$0xff]  ;;  %v1373_v14 = vpack.c.bf16 %v429_v62, %v428_v61 }
  0x22   :  { %1398 = vmatprep.subr.bf16.mxu1 %v1397_v44  ;;  %v460_v3 = vld [vmem:[#allocation3 + $0x1d0] sm:$0xff]  ;;  %v461_v4 = vld [vmem:[#allocation3 + $0x1d8] sm:$0xff]  ;;  %v430_v10 = vld [vmem:[#allocation3 + $0xe0] sm:$0xff]  ;;  %v1403_v13 = vpack.c.bf16 %v443_v60, %v442_v57  ;;  %v1375_v22 = vpack.c.bf16 %v413_v2, %v412_v1 }
  0x23   :  { %v1661_v5 = vld [vmem:[#allocation3 + $0x150] sm:$0xff]  ;;  %v445_v6 = vld [vmem:[#allocation3 + $0x158] sm:$0xff]  ;;  %1368 = vmatpush3.bf16.msra.mxu0 %v1367_v54  ;;  %v431_v11 = vld [vmem:[#allocation3 + $0xe8] sm:$0xff]  ;;  %v1405_v18 = vpack.c.bf16 %v461_v4, %v460_v3 }
  0x24   :  { %v1663_v12 = vld [vmem:[#allocation3 + $0x60] sm:$0xff]  ;;  %1370 = vmatprep.subr.bf16.mxu0 %v1369_v59  ;;  %v1665_v15 = vld [vmem:[#allocation3 + $0x68] sm:$0xff]  ;;  %v1671_v21 = vld [vmem:[#allocation3 + $0xf0] sm:$0xff]  ;;  %v1407_v23 = vpack.c.bf16 %v445_v6, %v1661_v5  ;;  %v1377_v28 = vpack.c.bf16 %v431_v11, %v430_v10 }
  0x25   :  { %1400 = vmatpush3.bf16.msra.mxu1 %v1399_v58  ;;  %v462_v16 = vld [vmem:[#allocation3 + $0x1e0] sm:$0xff]  ;;  %v463_v17 = vld [vmem:[#allocation3 + $0x1e8] sm:$0xff]  ;;  %v433_v24 = vld [vmem:[#allocation3 + $0xf8] sm:$0xff]  ;;  %v1379_v29 = vpack.c.bf16 %v1665_v15, %v1663_v12 }
  0x26   :  { %1402 = vmatprep.subr.bf16.mxu1 %v1401_v63  ;;  %v1667_v19 = vld [vmem:[#allocation3 + $0x160] sm:$0xff]  ;;  %v1669_v20 = vld [vmem:[#allocation3 + $0x168] sm:$0xff]  ;;  %v1674_v25 = vld [vmem:[#allocation3 + $0x70] sm:$0xff]  ;;  %v1409_v30 = vpack.c.bf16 %v463_v17, %v462_v16  ;;  %v1381_v35 = vpack.c.bf16 %v433_v24, %v1671_v21 }
  0x27   :  { %v1676_v26 = vld [vmem:[#allocation3 + $0x78] sm:$0xff]  ;;  %1372 = vmatpush3.bf16.msra.mxu0 %v1371_v9  ;;  %v1411_v31 = vpack.c.bf16 %v1669_v20, %v1667_v19  ;;  %v464_v32 = vld [vmem:[#allocation3 + $0x1f0] sm:$0xff]  ;;  %v61_v48 = vld [vmem:[%s1966_s0 + $0x58] sm:$0xff] }
  0x28   :  { %v465_v33 = vld [vmem:[#allocation3 + $0x1f8] sm:$0xff]  ;;  %v1684_v34 = vld [vmem:[#allocation3 + $0x170] sm:$0xff]  ;;  %1374 = vmatprep.subr.bf16.mxu0 %v1373_v14  ;;  %v1383_v36 = vpack.c.bf16 %v1676_v26, %v1674_v25  ;;  %v65_v49 = vld [vmem:[%s1966_s0 + $0x78] sm:$0xff]  ;;  %v92_v58 = vunpack.c.l.bf16 %v61_v48  ;;  %v93_v59 = vunpack.c.h.bf16 %v61_v48 }
  0x29   :  { %1404 = vmatpush3.bf16.msra.mxu1 %v1403_v13  ;;  %v1413_v37 = vpack.c.bf16 %v465_v33, %v464_v32  ;;  %v1689_v38 = vld [vmem:[#allocation3 + $0x178] sm:$0xff]  ;;  %v50_v39 = vld [vmem:[%s1966_s0] sm:$0xff]  ;;  %v100_v60 = vunpack.c.l.bf16 %v65_v49  ;;  %v101_v61 = vunpack.c.h.bf16 %v65_v49  ;;  %v482_v49 = vld [vmem:[#allocation3 + $0x280] sm:$0xff] }
  0x2a   :  { %v51_v40 = vld [vmem:[%s1966_s0 + $0x8] sm:$0xff]  ;;  %1406 = vmatprep.subr.bf16.mxu1 %v1405_v18  ;;  %v1415_v41 = vpack.c.bf16 %v1689_v38, %v1684_v34  ;;  %v56_v43 = vld [vmem:[%s1966_s0 + $0x30] sm:$0xff]  ;;  %v70_v45 = vunpack.c.l.bf16 %v50_v39  ;;  %v71_v46 = vunpack.c.h.bf16 %v50_v39  ;;  %v66_v50 = vld [vmem:[%s1966_s0 + $0x80] sm:$0xff] }
  0x2b   :  { %v55_v42 = vld [vmem:[%s1966_s0 + $0x28] sm:$0xff]  ;;  %v60_v44 = vld [vmem:[%s1966_s0 + $0x50] sm:$0xff]  ;;  %v72_v47 = vunpack.c.l.bf16 %v51_v40  ;;  %v73_v51 = vunpack.c.h.bf16 %v51_v40  ;;  %v82_v54 = vunpack.c.l.bf16 %v56_v43  ;;  %1376 = vmatpush3.bf16.msra.mxu0 %v1375_v22  ;;  %v83_v55 = vunpack.c.h.bf16 %v56_v43 }
  0x2c   :  { %v80_v52 = vunpack.c.l.bf16 %v55_v42  ;;  %v81_v53 = vunpack.c.h.bf16 %v55_v42  ;;  %v90_v56 = vunpack.c.l.bf16 %v60_v44  ;;  %v91_v57 = vunpack.c.h.bf16 %v60_v44  ;;  %1378 = vmatprep.subr.bf16.mxu0 %v1377_v28 }
  0x2d   :  { %1408 = vmatpush3.bf16.msra.mxu1 %v1407_v23  ;;  %v102_v62 = vunpack.c.l.bf16 %v66_v50  ;;  %v103_v63 = vunpack.c.h.bf16 %v66_v50  ;;  %v127_v3 = vadd.f32 %v82_v54, %v72_v47  ;;  %v134_v4 = vadd.f32 %v83_v55, %v73_v51  ;;  %v483_v50 = vld [vmem:[#allocation3 + $0x288] sm:$0xff]  ;;  %v514_v55 = vld [vmem:[#allocation3 + $0x380] sm:$0xff] }
  0x2e   :  { %1410 = vmatprep.subr.bf16.mxu1 %v1409_v30  ;;  %v113_v1 = vadd.f32 %v80_v52, %v70_v45  ;;  %v120_v2 = vadd.f32 %v81_v53, %v71_v46  ;;  %v183_v5 = vadd.f32 %v100_v60, %v90_v56  ;;  %v190_v6 = vadd.f32 %v101_v61, %v91_v57  ;;  %v515_v56 = vld [vmem:[#allocation3 + $0x388] sm:$0xff] }
  0x2f   :  { %v197_v7 = vadd.f32 %v102_v62, %v92_v58  ;;  %1380 = vmatpush3.bf16.msra.mxu0 %v1379_v29  ;;  %v128_v10 = vrot.slane %v127_v3, 4  ;;  %v204_v11 = vadd.f32 %v103_v63, %v93_v59  ;;  %v135_v12 = vrot.slane %v134_v4, 4 }
  0x30   :  { %v114_v8 = vrot.slane %v113_v1, 4  ;;  %v121_v9 = vrot.slane %v120_v2, 4  ;;  %1382 = vmatprep.subr.bf16.mxu0 %v1381_v35  ;;  %v184_v13 = vrot.slane %v183_v5, 4  ;;  %v191_v14 = vrot.slane %v190_v6, 4 }
  0x31   :  { %1412 = vmatpush3.bf16.msra.mxu1 %v1411_v31  ;;  %v198_v15 = vrot.slane %v197_v7, 4  ;;  %v129_v18 = vadd.f32 %v128_v10, %v127_v3  ;;  %v205_v19 = vrot.slane %v204_v11, 4  ;;  %v136_v20 = vadd.f32 %v135_v12, %v134_v4  ;;  %v1723_v10 = vld [vmem:[#allocation3 + $0x208] sm:$0xff] }
  0x32   :  { %1414 = vmatprep.subr.bf16.mxu1 %v1413_v37  ;;  %v115_v16 = vadd.f32 %v114_v8, %v113_v1  ;;  %v122_v17 = vadd.f32 %v121_v9, %v120_v2  ;;  %v185_v21 = vadd.f32 %v184_v13, %v183_v5  ;;  %v192_v22 = vadd.f32 %v191_v14, %v190_v6  ;;  %v1721_v9 = vld [vmem:[#allocation3 + $0x200] sm:$0xff]  ;;  %v1727_v12 = vld [vmem:[#allocation3 + $0x308] sm:$0xff]  ;;  %v1729_v13 = vld [vmem:[#allocation3 + $0x290] sm:$0xff] }
  0x33   :  { %v199_v23 = vadd.f32 %v198_v15, %v197_v7  ;;  %1384 = vmatpush3.bf16.msra.mxu0 %v1383_v36  ;;  %v130_v26 = vrot.slane %v129_v18, 2  ;;  %v206_v28 = vadd.f32 %v205_v19, %v204_v11  ;;  %v137_v29 = vrot.slane %v136_v20, 2  ;;  %v1725_v11 = vld [vmem:[#allocation3 + $0x300] sm:$0xff]  ;;  %v1731_v14 = vld [vmem:[#allocation3 + $0x298] sm:$0xff]  ;;  %v1737_v19 = vld [vmem:[#allocation3 + $0x390] sm:$0xff] }
  0x34   :  { %v116_v24 = vrot.slane %v115_v16, 2  ;;  %v123_v25 = vrot.slane %v122_v17, 2  ;;  %v186_v30 = vrot.slane %v185_v21, 2  ;;  %v193_v31 = vrot.slane %v192_v22, 2 }
  0x35   :  { %1416 = vmatpush3.bf16.msra.mxu1 %v1415_v41  ;;  %v200_v32 = vrot.slane %v199_v23, 2  ;;  %v131_v35 = vadd.f32 %v130_v26, %v129_v18  ;;  %v207_v37 = vrot.slane %v206_v28, 2  ;;  %v138_v38 = vadd.f32 %v137_v29, %v136_v20  ;;  %v1735_v18 = vld [vmem:[#allocation3 + $0x218] sm:$0xff] }
  0x36   :  { %v117_v33 = vadd.f32 %v116_v24, %v115_v16  ;;  %v124_v34 = vadd.f32 %v123_v25, %v122_v17  ;;  %v187_v39 = vadd.f32 %v186_v30, %v185_v21  ;;  %v194_v40 = vadd.f32 %v193_v31, %v192_v22  ;;  %v1733_v17 = vld [vmem:[#allocation3 + $0x210] sm:$0xff]  ;;  %v1739_v20 = vld [vmem:[#allocation3 + $0x398] sm:$0xff]  ;;  %v1741_v21 = vld [vmem:[#allocation3 + $0x2a0] sm:$0xff] }
  0x37   :  { %v201_v42 = vadd.f32 %v200_v32, %v199_v23  ;;  %v132_v36 = vrot.slane %v131_v35, 1  ;;  %v208_v45 = vadd.f32 %v207_v37, %v206_v28  ;;  %v139_v46 = vrot.slane %v138_v38, 1  ;;  %v1743_v22 = vld [vmem:[#allocation3 + $0x2a8] sm:$0xff]  ;;  %v52_v24 = vld [vmem:[%s1966_s0 + $0x10] sm:$0xff] }
  0x38   :  { %v118_v43 = vrot.slane %v117_v33, 1  ;;  %v125_v44 = vrot.slane %v124_v34, 1  ;;  %v188_v47 = vrot.slane %v187_v39, 1  ;;  %v195_v48 = vrot.slane %v194_v40, 1  ;;  %v53_v25 = vld [vmem:[%s1966_s0 + $0x18] sm:$0xff]  ;;  %v62_v37 = vld [vmem:[%s1966_s0 + $0x60] sm:$0xff] }
  0x39   :  { %v202_v41 = vrot.slane %v201_v42, 1  ;;  %v133_v53 = vadd.f32 %v132_v36, %v131_v35  ;;  %v209_v54 = vrot.slane %v208_v45, 1  ;;  %v140_v57 = vadd.f32 %v139_v46, %v138_v38  ;;  %v57_v30 = vld [vmem:[%s1966_s0 + $0x38] sm:$0xff]  ;;  %v58_v35 = vld [vmem:[%s1966_s0 + $0x40] sm:$0xff]  ;;  %v67_v36 = vld [vmem:[%s1966_s0 + $0x88] sm:$0xff] }
  0x3a   :  { %v119_v51 = vadd.f32 %v118_v43, %v117_v33  ;;  %v126_v52 = vadd.f32 %v125_v44, %v124_v34  ;;  %v189_v58 = vadd.f32 %v188_v47, %v187_v39  ;;  %v196_v59 = vadd.f32 %v195_v48, %v194_v40  ;;  %v1777_v39 = vld [vmem:[%s1966_s0 + $0x68] sm:$0xff] }
  0x3b   :  { %v203_v60 = vadd.f32 %v202_v41, %v201_v42  ;;  %v210_v61 = vadd.f32 %v209_v54, %v208_v45  ;;  %v1417_v63 = vpack.c.bf16 %v483_v50, %v482_v49  ;;  %v274_v1 = vcombine.low %v133_v53, %v140_v57  ;;  %v1786_v45 = vld [vmem:[%s1966_s0 + $0x90] sm:$0xff] }
  0x3c   :  { %v273_v62 = vcombine.low %v119_v51, %v126_v52  ;;  %v315_v2 = vcombine.low %v189_v58, %v196_v59  ;;  %v1449_v3 = vpack.c.bf16 %v515_v56, %v514_v55  ;;  %v1419_v26 = vpack.c.bf16 %v1723_v10, %v1721_v9  ;;  %v502_v10 = vld [vmem:[#allocation3 + $0x320] sm:$0xff] }
  0x3d   :  { %v316_v5 = vcombine.low %v203_v60, %v210_v61  ;;  %1418 = vmatprep.subr.bf16.mxu0 %v1417_v63  ;;  %v288_v6 = vrot.slane %v274_v1, %v1678_v27  ;;  %v1451_v28 = vpack.c.bf16 %v1727_v12, %v1725_v11  ;;  %v1421_v29 = vpack.c.bf16 %v1731_v14, %v1729_v13  ;;  %v521_v11 = vld [vmem:[#allocation3 + $0x3b8] sm:$0xff] }
  0x3e   :  { %v281_v4 = vrot.slane %v273_v62, %v1678_v27  ;;  %v323_v7 = vrot.slane %v315_v2, %v1678_v27  ;;  %1450 = vmatprep.subr.bf16.mxu1 %v1449_v3  ;;  %v1423_v32 = vpack.c.bf16 %v1735_v18, %v1733_v17  ;;  %v1453_v33 = vpack.c.bf16 %v1739_v20, %v1737_v19  ;;  %v491_v19 = vld [vmem:[#allocation3 + $0x2c8] sm:$0xff] }
  0x3f   :  { %v330_v8 = vrot.slane %v316_v5, %v1678_v27  ;;  %v1425_v34 = vpack.c.bf16 %v1743_v22, %v1741_v21  ;;  %v74_v40 = vunpack.c.l.bf16 %v52_v24  ;;  %v75_v42 = vunpack.c.h.bf16 %v52_v24 }
  0x40   :  { %v289_v15 = vcombine.low %v281_v4, %v288_v6  ;;  %v76_v43 = vunpack.c.l.bf16 %v53_v25  ;;  %v77_v46 = vunpack.c.h.bf16 %v53_v25  ;;  %v84_v47 = vunpack.c.l.bf16 %v57_v30 }
  0x41   :  { %v331_v16 = vcombine.low %v323_v7, %v330_v8  ;;  %v85_v48 = vunpack.c.h.bf16 %v57_v30  ;;  %v86_v49 = vunpack.c.l.bf16 %v58_v35  ;;  %v87_v50 = vunpack.c.h.bf16 %v58_v35 }
  0x42   :  { %v94_v51 = vunpack.c.l.bf16 %v62_v37  ;;  %v95_v52 = vunpack.c.h.bf16 %v62_v37  ;;  %v96_v53 = vunpack.c.l.bf16 %v1777_v39  ;;  %v97_v54 = vunpack.c.h.bf16 %v1777_v39  ;;  %v505_v39 = vld [vmem:[#allocation3 + $0x338] sm:$0xff] }
  0x43   :  { %v361_v23 = vrot.slane %v331_v16, 7  ;;  %v104_v55 = vunpack.c.l.bf16 %v67_v36  ;;  %v105_v56 = vunpack.c.h.bf16 %v67_v36  ;;  %v106_v57 = vunpack.c.l.bf16 %v1786_v45  ;;  %v1795_v36 = vld [vmem:[#allocation3 + $0x220] sm:$0xff] }
  0x44   :  { %v107_v58 = vunpack.c.h.bf16 %v1786_v45  ;;  %v141_v60 = vadd.f32 %v84_v47, %v74_v40  ;;  %v148_v61 = vadd.f32 %v85_v48, %v75_v42  ;;  %v155_v62 = vadd.f32 %v86_v49, %v76_v43  ;;  %v500_v43 = vld [vmem:[#allocation3 + $0x310] sm:$0xff]  ;;  %v518_v49 = vld [vmem:[#allocation3 + $0x3a0] sm:$0xff]  ;;  %v1829_v45 = vld [vmem:[#allocation3 + $0x248] sm:$0xff] }
  0x45   :  { %v363_v31 = vsel %vm362_vm0, %v361_v23, %v289_v15  ;;  %v162_v63 = vadd.f32 %v87_v50, %v77_v46  ;;  %v211_v1 = vadd.f32 %v104_v55, %v94_v51  ;;  %v218_v2 = vadd.f32 %v105_v56, %v95_v52  ;;  %v519_v55 = vld [vmem:[#allocation3 + $0x3a8] sm:$0xff]  ;;  %v488_v56 = vld [vmem:[#allocation3 + $0x2b0] sm:$0xff] }
  0x46   :  { %v365_v38 = vsel %vm364_vm1, %v361_v23, %v363_v31  ;;  %v225_v3 = vadd.f32 %v106_v57, %v96_v53  ;;  %v142_v6 = vrot.slane %v141_v60, 4  ;;  %v149_v7 = vrot.slane %v148_v61, 4  ;;  %v489_v57 = vld [vmem:[#allocation3 + $0x2b8] sm:$0xff] }
  0x47   :  { %v367_v44 = vsel %vm366_vm2, %v361_v23, %v365_v38  ;;  %v156_v8 = vrot.slane %v155_v62, 4  ;;  %v163_v15 = vrot.slane %v162_v63, 4  ;;  %v212_v16 = vrot.slane %v211_v1, 4 }
  0x48   :  { %v369_v41 = vsel %vm368_vm3, %v361_v23, %v367_v44  ;;  %v219_v23 = vrot.slane %v218_v2, 4  ;;  %v143_v30 = vadd.f32 %v142_v6, %v141_v60  ;;  %v150_v31 = vadd.f32 %v149_v7, %v148_v61  ;;  %v501_v44 = vld [vmem:[#allocation3 + $0x318] sm:$0xff]  ;;  %v520_v6 = vld [vmem:[#allocation3 + $0x3b0] sm:$0xff] }
  0x49   :  { %v399_v59 = vmul.f32 0.0625, %v369_v41  ;;  %v157_v35 = vadd.f32 %v156_v8, %v155_v62  ;;  %v164_v37 = vadd.f32 %v163_v15, %v162_v63  ;;  %v213_v38 = vadd.f32 %v212_v16, %v211_v1  ;;  %v1797_v41 = vld [vmem:[#allocation3 + $0x228] sm:$0xff]  ;;  %v504_v15 = vld [vmem:[#allocation3 + $0x330] sm:$0xff]  ;;  %v1827_v16 = vld [vmem:[#allocation3 + $0x240] sm:$0xff] }
  0x4a   :  { %v220_v40 = vadd.f32 %v219_v23, %v218_v2  ;;  %v144_v46 = vrot.slane %v143_v30, 2  ;;  %v151_v47 = vrot.slane %v150_v31, 2  ;;  %v226_v48 = vrot.slane %v225_v3, 4  ;;  %v1808_v2 = vld [vmem:[#allocation3 + $0x230] sm:$0xff]  ;;  %v522_v23 = vld [vmem:[#allocation3 + $0x3c0] sm:$0xff] }
  0x4b   :  { %v579_v4 = vrot.slane %v399_v59, %v1678_v27  ;;  %v572_v5 = vcombine.high %v399_v59, %v399_v59  ;;  %v158_v50 = vrot.slane %v157_v35, 2  ;;  %v165_v51 = vrot.slane %v164_v37, 2 }
  0x4c   :  { %v214_v52 = vrot.slane %v213_v38, 2  ;;  %v221_v53 = vrot.slane %v220_v40, 2  ;;  %v145_v59 = vadd.f32 %v144_v46, %v143_v30  ;;  %v152_v60 = vadd.f32 %v151_v47, %v150_v31  ;;  %v1835_v30 = vld [vmem:[#allocation3 + $0x348] sm:$0xff]  ;;  %v1837_v31 = vld [vmem:[#allocation3 + $0x2d0] sm:$0xff] }
  0x4d   :  { %v587_v24 = vcombine.high %v579_v4, %v579_v4  ;;  %v586_v25 = vrot.slane %v572_v5, %v1678_v27  ;;  %v227_v61 = vadd.f32 %v226_v48, %v225_v3  ;;  %v159_v62 = vadd.f32 %v158_v50, %v157_v35  ;;  %v473_v3 = vld [vmem:[#allocation3 + $0x238] sm:$0xff]  ;;  %v54_v46 = vld [vmem:[%s1966_s0 + $0x20] sm:$0xff] }
  0x4e   :  { %v166_v63 = vadd.f32 %v165_v51, %v164_v37  ;;  %v215_v1 = vadd.f32 %v214_v52, %v213_v38  ;;  %v1455_v9 = vpack.c.bf16 %v501_v44, %v500_v43  ;;  %v1427_v13 = vpack.c.bf16 %v1797_v41, %v1795_v36  ;;  %v493_v35 = vld [vmem:[#allocation3 + $0x2d8] sm:$0xff]  ;;  %v1839_v38 = vld [vmem:[#allocation3 + $0x250] sm:$0xff] }
  0x4f   :  { %688 = vmatprep.mubr.f32.mxu0 %v587_v24  ;;  %v588_v42 = vcombine.high %v586_v25, %v586_v25  ;;  %v228_v5 = vrot.slane %v227_v61, 2  ;;  %v1457_v14 = vpack.c.bf16 %v519_v55, %v518_v49  ;;  %v232_v12 = vadd.f32 %v107_v58, %v97_v54  ;;  %v523_v24 = vld [vmem:[#allocation3 + $0x3c8] sm:$0xff]  ;;  %v1846_v47 = vld [vmem:[#allocation3 + $0x3d0] sm:$0xff]  ;;  %v525_v48 = vld [vmem:[#allocation3 + $0x3d8] sm:$0xff] }
  0x50   :  { %689 = vmatmul.mubr.f32.vlgmr.msra.gmra.mrb[0].mxu0 %v579_v4  ;;  %v222_v4 = vadd.f32 %v221_v53, %v220_v40  ;;  %v146_v20 = vrot.slane %v145_v59, 1  ;;  %v160_v7 = vrot.slane %v159_v62, 1  ;;  %v167_v8 = vrot.slane %v166_v63, 1  ;;  %v1841_v40 = vld [vmem:[#allocation3 + $0x258] sm:$0xff] }
  0x51   :  { %1420 = vmatpush3.bf16.msra.mxu0 %v1419_v26  ;;  %758 = vmatprep.mubr.f32.mxu1 %v588_v42  ;;  %v503_v26 = vld [vmem:[#allocation3 + $0x328] sm:$0xff]  ;;  %v216_v54 = vrot.slane %v215_v1, 1  ;;  %v229_v18 = vadd.f32 %v228_v5, %v227_v61  ;;  %v1431_v21 = vpack.c.bf16 %v473_v3, %v1808_v2  ;;  %v1461_v22 = vpack.c.bf16 %v521_v11, %v520_v6 }
  0x52   :  { %759 = vmatmul.mubr.f32.vlgmr.msra.gmra.mrb[0].mxu1 %v586_v25  ;;  %1422 = vmatprep.subr.bf16.mxu0 %v1421_v29  ;;  %v1429_v29 = vpack.c.bf16 %v489_v57, %v488_v56  ;;  %v223_v17 = vrot.slane %v222_v4, 1  ;;  %v1459_v58 = vpack.c.bf16 %v503_v26, %v502_v10  ;;  %v1831_v25 = vld [vmem:[#allocation3 + $0x340] sm:$0xff]  ;;  %v147_v42 = vadd.f32 %v146_v20, %v145_v59  ;;  %v59_v57 = vld [vmem:[%s1966_s0 + $0x48] sm:$0xff]  ;;  %v495_v26 = vld [vmem:[#allocation3 + $0x2e8] sm:$0xff] }
  0x53   :  { %1452 = vmatpush3.bf16.msra.mxu1 %v1451_v28  ;;  %v1822_v28 = vld [vmem:[#allocation3 + $0x2c0] sm:$0xff]  ;;  %v161_v44 = vadd.f32 %v160_v7, %v159_v62  ;;  %v168_v36 = vadd.f32 %v167_v8, %v166_v63  ;;  %v217_v41 = vadd.f32 %v216_v54, %v215_v1  ;;  %v230_v50 = vrot.slane %v229_v18, 1  ;;  %v509_v20 = vld [vmem:[#allocation3 + $0x358] sm:$0xff] }
  0x54   :  { %1454 = vmatprep.subr.bf16.mxu1 %v1453_v33  ;;  %v153_v33 = vrot.slane %v152_v60, 1  ;;  %v224_v49 = vadd.f32 %v223_v17, %v222_v4  ;;  %v1463_v52 = vpack.c.bf16 %v505_v39, %v504_v15  ;;  %v1435_v53 = vpack.c.bf16 %v1829_v45, %v1827_v16  ;;  %v64_v62 = vld [vmem:[%s1966_s0 + $0x70] sm:$0xff]  ;;  %v69_v63 = vld [vmem:[%s1966_s0 + $0x98] sm:$0xff] }
  0x55   :  { %1424 = vmatpush3.bf16.msra.mxu0 %v1423_v32  ;;  %v233_v32 = vrot.slane %v232_v12, 4  ;;  %v1465_v55 = vpack.c.bf16 %v523_v24, %v522_v23  ;;  %v1467_v56 = vpack.c.bf16 %v1835_v30, %v1831_v25  ;;  %v1437_v59 = vpack.c.bf16 %v493_v35, %v1837_v31  ;;  %v494_v10 = vld [vmem:[#allocation3 + $0x2e0] sm:$0xff]  ;;  %v527_v45 = vld [vmem:[#allocation3 + $0x3e8] sm:$0xff]  ;;  %v496_v23 = vld [vmem:[#allocation3 + $0x2f0] sm:$0xff] }
  0x56   :  { %1426 = vmatprep.subr.bf16.mxu0 %v1425_v34  ;;  %v1433_v34 = vpack.c.bf16 %v491_v19, %v1822_v28  ;;  %v154_v43 = vadd.f32 %v153_v33, %v152_v60  ;;  %v1439_v60 = vpack.c.bf16 %v1841_v40, %v1839_v38  ;;  %v78_v1 = vunpack.c.l.bf16 %v54_v46  ;;  %v508_v19 = vld [vmem:[#allocation3 + $0x350] sm:$0xff]  ;;  %v478_v39 = vld [vmem:[#allocation3 + $0x260] sm:$0xff]  ;;  %v497_v24 = vld [vmem:[#allocation3 + $0x2f8] sm:$0xff] }
  0x57   :  { %1456 = vmatpush3.bf16.msra.mxu1 %v1455_v9  ;;  %v234_v37 = vadd.f32 %v233_v32, %v232_v12  ;;  %v1469_v9 = vpack.c.bf16 %v525_v48, %v1846_v47  ;;  %v291_v4 = vcombine.low %v161_v44, %v168_v36  ;;  %v79_v5 = vunpack.c.h.bf16 %v54_v46  ;;  %v526_v16 = vld [vmem:[#allocation3 + $0x3e0] sm:$0xff]  ;;  %v511_v40 = vld [vmem:[#allocation3 + $0x368] sm:$0xff]  ;;  %v528_v47 = vld [vmem:[#allocation3 + $0x3f0] sm:$0xff] }
  0x58   :  { %1458 = vmatprep.subr.bf16.mxu1 %v1457_v14  ;;  %v290_v2 = vcombine.low %v147_v42, %v154_v43  ;;  %v88_v3 = vunpack.c.l.bf16 %v59_v57  ;;  %v89_v6 = vunpack.c.h.bf16 %v59_v57  ;;  %v98_v11 = vunpack.c.l.bf16 %v64_v62  ;;  %v510_v38 = vld [vmem:[#allocation3 + $0x360] sm:$0xff]  ;;  %v529_v48 = vld [vmem:[#allocation3 + $0x3f8] sm:$0xff] }
  0x59   :  { %1428 = vmatpush3.bf16.msra.mxu0 %v1427_v13  ;;  %v235_v51 = vrot.slane %v234_v37, 2  ;;  %v231_v13 = vadd.f32 %v230_v50, %v229_v18  ;;  %v99_v12 = vunpack.c.h.bf16 %v64_v62  ;;  %v108_v28 = vunpack.c.l.bf16 %v69_v63  ;;  %v480_v50 = vld [vmem:[#allocation3 + $0x270] sm:$0xff] }
  0x5a   :  { %1430 = vmatprep.subr.bf16.mxu0 %v1429_v29  ;;  %v332_v29 = vcombine.low %v217_v41, %v224_v49  ;;  %v1441_v33 = vpack.c.bf16 %v495_v26, %v494_v10  ;;  %v109_v8 = vunpack.c.h.bf16 %v69_v63  ;;  %v169_v15 = vadd.f32 %v88_v3, %v78_v1  ;;  %v513_v10 = vld [vmem:[#allocation3 + $0x378] sm:$0xff] }
  0x5b   :  { %1460 = vmatpush3.bf16.msra.mxu1 %v1459_v58  ;;  %v236_v61 = vadd.f32 %v235_v51, %v234_v37  ;;  %v298_v54 = vrot.slane %v290_v2, %v1678_v27  ;;  %v305_v17 = vrot.slane %v291_v4, %v1678_v27  ;;  %v176_v18 = vadd.f32 %v89_v6, %v79_v5  ;;  %v479_v58 = vld [vmem:[#allocation3 + $0x268] sm:$0xff]  ;;  %v481_v51 = vld [vmem:[#allocation3 + $0x278] sm:$0xff] }
  0x5c   :  { %1462 = vmatprep.subr.bf16.mxu1 %v1461_v22  ;;  %v239_v32 = vadd.f32 %v108_v28, %v98_v11  ;;  %v170_v22 = vrot.slane %v169_v15, 4  ;;  %v1471_v30 = vpack.c.bf16 %v509_v20, %v508_v19  ;;  %v1473_v37 = vpack.c.bf16 %v527_v45, %v526_v16 }
  0x5d   :  { %1432 = vmatpush3.bf16.msra.mxu0 %v1431_v21  ;;  %v237_v14 = vrot.slane %v236_v61, 1  ;;  %v340_v21 = vrot.slane %v332_v29, %v1678_v27  ;;  %v177_v31 = vrot.slane %v176_v18, 4  ;;  %v1443_v36 = vpack.c.bf16 %v479_v58, %v478_v39 }
  0x5e   :  { %1434 = vmatprep.subr.bf16.mxu0 %v1433_v34  ;;  %v246_v34 = vadd.f32 %v109_v8, %v99_v12  ;;  %v240_v35 = vrot.slane %v239_v32, 4  ;;  %v171_v43 = vadd.f32 %v170_v22, %v169_v15  ;;  %v1445_v46 = vpack.c.bf16 %v497_v24, %v496_v23  ;;  %v548_v24 = vld [vmem:[#allocation3 + $0x490] sm:$0xff] }
  0x5f   :  { %1464 = vmatpush3.bf16.msra.mxu1 %v1463_v52  ;;  %v238_v7 = vadd.f32 %v237_v14, %v236_v61  ;;  %v178_v41 = vadd.f32 %v177_v31, %v176_v18  ;;  %v306_v52 = vcombine.low %v298_v54, %v305_v17  ;;  %v1475_v57 = vpack.c.bf16 %v511_v40, %v510_v38  ;;  %v547_v61 = vld [vmem:[#allocation3 + $0x488] sm:$0xff]  ;;  %v530_v18 = vld [vmem:[#allocation3 + $0x400] sm:$0xff]  ;;  %v532_v38 = vld [vmem:[#allocation3 + $0x410] sm:$0xff] }
  0x60   :  { %1466 = vmatprep.subr.bf16.mxu1 %v1465_v55  ;;  %v247_v44 = vrot.slane %v246_v34, 4  ;;  %v241_v49 = vadd.f32 %v240_v35, %v239_v32  ;;  %v172_v55 = vrot.slane %v171_v43, 2  ;;  %v1447_v4 = vpack.c.bf16 %v481_v51, %v480_v50  ;;  %v531_v32 = vld [vmem:[#allocation3 + $0x408] sm:$0xff]  ;;  %v533_v40 = vld [vmem:[#allocation3 + $0x418] sm:$0xff]  ;;  %v534_v50 = vld [vmem:[#allocation3 + $0x420] sm:$0xff] }
  0x61   :  { %1436 = vmatpush3.bf16.msra.mxu0 %v1435_v53  ;;  %v333_v25 = vcombine.low %v231_v13, %v238_v7  ;;  %v179_v62 = vrot.slane %v178_v41, 2  ;;  %v1483_v31 = vpack.c.bf16 %v531_v32, %v530_v18  ;;  %v535_v51 = vld [vmem:[#allocation3 + $0x428] sm:$0xff]  ;;  %v1010_v32 = vld [vmem:[%s1971_s5 + $0x8] sm:$0xff] }
  0x62   :  { %1438 = vmatprep.subr.bf16.mxu0 %v1437_v59  ;;  %v546_v59 = vld [vmem:[#allocation3 + $0x480] sm:$0xff]  ;;  %v242_v63 = vrot.slane %v241_v49, 2  ;;  %v173_v26 = vadd.f32 %v172_v55, %v171_v43  ;;  %v553_v55 = vld [vmem:[#allocation3 + $0x4b8] sm:$0xff] }
  0x63   :  { %1468 = vmatpush3.bf16.msra.mxu1 %v1467_v56  ;;  %v347_v42 = vrot.slane %v333_v25, %v1678_v27  ;;  %v248_v56 = vadd.f32 %v247_v44, %v246_v34  ;;  %v180_v5 = vadd.f32 %v179_v62, %v178_v41  ;;  %v1481_v29 = vpack.c.bf16 %v547_v61, %v546_v59  ;;  %v549_v25 = vld [vmem:[#allocation3 + $0x498] sm:$0xff]  ;;  %v550_v43 = vld [vmem:[#allocation3 + $0x4a0] sm:$0xff]  ;;  %v551_v44 = vld [vmem:[#allocation3 + $0x4a8] sm:$0xff] }
  0x64   :  { %1470 = vmatprep.subr.bf16.mxu1 %v1469_v9  ;;  %v512_v9 = vld [vmem:[#allocation3 + $0x370] sm:$0xff]  ;;  %v243_v13 = vadd.f32 %v242_v63, %v241_v49  ;;  %v174_v3 = vrot.slane %v173_v26, 1  ;;  %v1489_v49 = vpack.c.bf16 %v551_v44, %v550_v43  ;;  %v537_v62 = vld [vmem:[#allocation3 + $0x438] sm:$0xff]  ;;  %v554_v63 = vld [vmem:[#allocation3 + $0x4c0] sm:$0xff] }
  0x65   :  { %1440 = vmatpush3.bf16.msra.mxu0 %v1439_v60  ;;  %v348_v53 = vcombine.low %v340_v21, %v347_v42  ;;  %v1477_v60 = vpack.c.bf16 %v529_v48, %v528_v47  ;;  %v249_v2 = vrot.slane %v248_v56, 2  ;;  %v1479_v12 = vpack.c.bf16 %v513_v10, %v512_v9  ;;  %v536_v61 = vld [vmem:[#allocation3 + $0x430] sm:$0xff]  ;;  %v538_v10 = vld [vmem:[#allocation3 + $0x440] sm:$0xff] }
  0x66   :  { %1442 = vmatprep.subr.bf16.mxu0 %v1441_v33  ;;  %v181_v28 = vrot.slane %v180_v5, 1  ;;  %v244_v19 = vrot.slane %v243_v13, 1  ;;  %v175_v33 = vadd.f32 %v174_v3, %v173_v26  ;;  %v1487_v48 = vpack.c.bf16 %v533_v40, %v532_v38  ;;  %v539_v26 = vld [vmem:[#allocation3 + $0x448] sm:$0xff]  ;;  %v540_v3 = vld [vmem:[#allocation3 + $0x450] sm:$0xff] }
  0x67   :  { %1472 = vmatpush3.bf16.msra.mxu1 %v1471_v30  ;;  %v372_v1 = vrot.slane %v348_v53, 7  ;;  %v250_v6 = vadd.f32 %v249_v2, %v248_v56  ;;  %v552_v53 = vld [vmem:[#allocation3 + $0x4b0] sm:$0xff] }
  0x68   :  { %1474 = vmatprep.subr.bf16.mxu1 %v1473_v37  ;;  %v182_v15 = vadd.f32 %v181_v28, %v180_v5  ;;  %v245_v39 = vadd.f32 %v244_v19, %v243_v13  ;;  %v1485_v37 = vpack.c.bf16 %v549_v25, %v548_v24  ;;  %v1493_v59 = vpack.c.bf16 %v553_v55, %v552_v53  ;;  %v556_v2 = vld [vmem:[#allocation3 + $0x4d0] sm:$0xff]  ;;  %v1122_v25 = vld [vmem:[%s1968_s2] ss:$0 sm:$0xff] }
  0x69   :  { %1444 = vmatpush3.bf16.msra.mxu0 %v1443_v36  ;;  %v373_v14 = vsel %vm362_vm0, %v372_v1, %v306_v52  ;;  %v251_v7 = vrot.slane %v250_v6, 1  ;;  %v1499_v13 = vpack.c.bf16 %v539_v26, %v538_v10  ;;  %v1017_v10 = vld [vmem:[%s1971_s5 + $0x40] sm:$0xff]  ;;  %v1018_v26 = vld [vmem:[%s1971_s5 + $0x48] sm:$0xff] }
  0x6a   :  { %1446 = vmatprep.subr.bf16.mxu0 %v1445_v46  ;;  %v374_v11 = vsel %vm364_vm1, %v372_v1, %v373_v14  ;;  %v307_v45 = vcombine.low %v175_v33, %v182_v15  ;;  %v112_v46 = vld [vmem:[#allocation2 + $0x10] sm:$0xf]  ;;  %v560_v15 = vld [vmem:[#allocation3 + $0x4f0] sm:$0xff] }
  0x6b   :  { %1476 = vmatpush3.bf16.msra.mxu1 %v1475_v57  ;;  %v375_v20 = vsel %vm366_vm2, %v372_v1, %v374_v11  ;;  %v252_v16 = vadd.f32 %v251_v7, %v250_v6  ;;  %v1491_v57 = vpack.c.bf16 %v535_v51, %v534_v50  ;;  %v541_v6 = vld [vmem:[#allocation3 + $0x458] sm:$0xff]  ;;  %v558_v11 = vld [vmem:[#allocation3 + $0x4e0] sm:$0xff] }
  0x6c   :  { %1478 = vmatprep.subr.bf16.mxu1 %v1477_v60  ;;  %v376_v8 = vsel %vm368_vm3, %v372_v1, %v375_v20  ;;  %v314_v21 = vrot.slane %v307_v45, %v1678_v27  ;;  %v555_v60 = vld [vmem:[#allocation3 + $0x4c8] sm:$0xff]  ;;  %v1495_v1 = vpack.c.bf16 %v537_v62, %v536_v61  ;;  %v1503_v19 = vpack.c.bf16 %v541_v6, %v540_v3  ;;  %v542_v7 = vld [vmem:[#allocation3 + $0x460] sm:$0xff]  ;;  %v1014_v62 = vld [vmem:[%s1971_s5 + $0x28] sm:$0xff] }
  0x6d   :  { %1448 = vmatpush3.bf16.msra.mxu0 %v1447_v4  ;;  %v400_v54 = vmul.f32 0.0625, %v376_v8  ;;  %v349_v17 = vcombine.low %v245_v39, %v252_v16  ;;  %v1497_v9 = vpack.c.bf16 %v555_v60, %v554_v63  ;;  %v557_v4 = vld [vmem:[#allocation3 + $0x4d8] sm:$0xff]  ;;  %v543_v8 = vld [vmem:[#allocation3 + $0x468] sm:$0xff] }
  0x6e   :  { %1482 = vmatprep.subr.bf16.mxu0 %v1481_v29  ;;  %v1501_v29 = vpack.c.bf16 %v557_v4, %v556_v2  ;;  %v561_v39 = vld [vmem:[#allocation3 + $0x4f8] sm:$0xff]  ;;  %v1507_v16 = vpack.c.bf16 %v543_v8, %v542_v7  ;;  %v1013_v61 = vld [vmem:[%s1971_s5 + $0x20] sm:$0xff]  ;;  %v1526_v2 = vpack.c.bf16 %v1018_v26, %v1017_v10  ;;  %v1024_v6 = vld [vmem:[%s1971_s5 + $0x78] sm:$0xff] }
  0x6f   :  { %1480 = vmatpush3.bf16.msra.mxu1 %v1479_v12  ;;  %v596_v58 = vrot.slane %v400_v54, %v1678_v27  ;;  %v589_v23 = vcombine.high %v400_v54, %v400_v54  ;;  %v356_v22 = vrot.slane %v349_v17, %v1678_v27  ;;  %v559_v12 = vld [vmem:[#allocation3 + $0x4e8] sm:$0xff]  ;;  %v1509_v45 = vpack.c.bf16 %v561_v39, %v560_v15  ;;  %v544_v54 = vld [vmem:[#allocation3 + $0x470] sm:$0xff]  ;;  %v545_v17 = vld [vmem:[#allocation3 + $0x478] sm:$0xff] }
  0x70   :  { %v1505_v33 = vpack.c.bf16 %v559_v12, %v558_v11  ;;  %v1511_v18 = vpack.c.bf16 %v545_v17, %v544_v54  ;;  %v1520_v63 = vpack.c.bf16 %v1014_v62, %v1013_v61  ;;  %v1015_v60 = vld [vmem:[%s1971_s5 + $0x30] sm:$0xff]  ;;  %v1124_v54 = vld [vmem:[%s1970_s4] ss:$0 sm:$0xff] }
  0x71   :  { %v604_v34 = vcombine.high %v596_v58, %v596_v58  ;;  %v603_v30 = vrot.slane %v589_v23, %v1678_v27  ;;  %v379_v35 = vrot.slane %v356_v22, 7  ;;  %v1019_v4 = vld [vmem:[%s1971_s5 + $0x50] sm:$0xff] }
  0x73   :  { %828 = vmatprep.mubr.f32.mxu0 %v604_v34  ;;  %v605_v42 = vcombine.high %v603_v30, %v603_v30  ;;  %v380_v36 = vsel %vm362_vm0, %v379_v35, %v314_v21 }
  0x74   :  { %829 = vmatmul.mubr.f32.vlgmr.msra.gmra.mrb[2].mxu0 %v596_v58  ;;  %v381_v47 = vsel %vm364_vm1, %v379_v35, %v380_v36  ;;  %v1600_v58 = vmov 0.0|0.0  }
  0x75   :  { %898 = vmatprep.mubr.f32.mxu1 %v605_v42  ;;  %1484 = vmatpush3.bf16.msra.mxu0 %v1483_v31  ;;  %v382_v41 = vsel %vm366_vm2, %v379_v35, %v381_v47 }
  0x76   :  { %899 = vmatmul.mubr.f32.vlgmr.msra.gmra.mrb[2].mxu1 %v603_v30  ;;  %1486 = vmatprep.subr.bf16.mxu0 %v1485_v37  ;;  %v383_v52 = vsel %vm368_vm3, %v379_v35, %v382_v41 }
  0x77   :  { %v389_v56 = vadd.f32 %v383_v52, %v112_v46  ;;  %1513 = vmatprep.subr.bf16.mxu1 %v1600_v58  ;;  %1350 = vmatprep.mubr.msk.f32.mxu1 %vm1601_vm5, %v1598_v0  ;;  %v1023_v0 = vld [vmem:[%s1971_s5 + $0x70] sm:$0xff] }
  0x78   :  { %v1535_v11 = vpack.c.bf16 %v1024_v6, %v1023_v0 }
  0x79   :  { %1488 = vmatpush3.bf16.msra.mxu0 %v1487_v48  ;;  %392 = vst [vmem:[#allocation2 + $0x10] sm:$0xf] %v389_v56  ;;  %v1011_v56 = vld [vmem:[%s1971_s5 + $0x10] sm:$0xff] }
  0x7a   :  { %1490 = vmatprep.subr.bf16.mxu0 %v1489_v49 }
  0x7d   :  { %1492 = vmatpush3.bf16.msra.mxu0 %v1491_v57  ;;  %v1012_v57 = vld [vmem:[%s1971_s5 + $0x18] sm:$0xff] }
  0x7e   :  { %1494 = vmatprep.subr.bf16.mxu0 %v1493_v59  ;;  %v1517_v59 = vpack.c.bf16 %v1012_v57, %v1011_v56 }
  0x80   :  { %v398_v5 = vld [vmem:[#allocation2 + $0x10] sm:$0xf] }
  0x81   :  { %1496 = vmatpush3.bf16.msra.mxu0 %v1495_v1  ;;  %v401_v14 = vmul.f32 0.0625, %v398_v5  ;;  %v1016_v1 = vld [vmem:[%s1971_s5 + $0x38] sm:$0xff] }
  0x82   :  { %1498 = vmatprep.subr.bf16.mxu0 %v1497_v9  ;;  %v1523_v9 = vpack.c.bf16 %v1016_v1, %v1015_v60  ;;  %v1020_v5 = vld [vmem:[%s1971_s5 + $0x58] sm:$0xff] }
  0x83   :  { %v612_v28 = vrot.slane %v401_v14, %v1678_v27  ;;  %v1009_v27 = vld [vmem:[%s1971_s5] sm:$0xff] }
  0x84   :  { %v1514_v23 = vpack.c.bf16 %v1010_v32, %v1009_v27  ;;  %v1021_v14 = vld [vmem:[%s1971_s5 + $0x60] sm:$0xff] }
  0x85   :  { %1500 = vmatpush3.bf16.msra.mxu0 %v1499_v13  ;;  %v613_v20 = vcombine.high %v612_v28, %v612_v28  ;;  %v1529_v13 = vpack.c.bf16 %v1020_v5, %v1019_v4 }
  0x86   :  { %1502 = vmatprep.subr.bf16.mxu0 %v1501_v29  ;;  %1515 = vmatpush3.bf16.msra.mxu1 %v1514_v23  ;;  %v1022_v29 = vld [vmem:[%s1971_s5 + $0x68] sm:$0xff] }
  0x87   :  { %968 = vmatprep.mubr.f32.mxu0 %v613_v20  ;;  %1516 = vmatprep.subr.bf16.mxu1 %v1600_v58  ;;  %v1532_v3 = vpack.c.bf16 %v1022_v29, %v1021_v14 }
  0x89   :  { %1504 = vmatpush3.bf16.msra.mxu0 %v1503_v19 }
  0x8a   :  { %1506 = vmatprep.subr.bf16.mxu0 %v1505_v33  ;;  %1518 = vmatpush3.bf16.msra.mxu1 %v1517_v59 }
  0x8b   :  { %1519 = vmatprep.subr.bf16.mxu1 %v1600_v58 }
  0x8d   :  { %1508 = vmatpush3.bf16.msra.mxu0 %v1507_v16  ;;  %v1123_v16 = vld [vmem:[%s1969_s3] ss:$0 sm:$0xff] }
  0x8e   :  { %1510 = vmatprep.subr.bf16.mxu0 %v1509_v45  ;;  %1521 = vmatpush3.bf16.msra.mxu1 %v1520_v63 }
  0x8f   :  { %1522 = vmatprep.subr.bf16.mxu1 %v1600_v58 }
  0x91   :  { %1512 = vmatpush3.bf16.msra.mxu0 %v1511_v18 }
  0x92   :  { %1524 = vmatpush3.bf16.msra.mxu1 %v1523_v9 }
  0x93   :  { %1525 = vmatprep.subr.bf16.mxu1 %v1600_v58 }
  0x94   :  { %969 = vmatmul.mubr.f32.vlgmr.msra.gmra.mrb[4].mxu0 %v612_v28 }
  0x96   :  { %1527 = vmatpush3.bf16.msra.mxu1 %v1526_v2 }
  0x97   :  { %1528 = vmatprep.subr.bf16.mxu1 %v1600_v58 }
  0x9a   :  { %1530 = vmatpush3.bf16.msra.mxu1 %v1529_v13 }
  0x9b   :  { %1531 = vmatprep.subr.bf16.mxu1 %v1600_v58 }
  0x9e   :  { %1533 = vmatpush3.bf16.msra.mxu1 %v1532_v3 }
  0x9f   :  { %1534 = vmatprep.subr.bf16.mxu1 %v1600_v58 }
  0xa2   :  { %1536 = vmatpush3.bf16.msra.mxu1 %v1535_v11 }
 0x123   :  { %v1158_v24 = vpop.f32.mrb[0].mxu0 }
 0x124   :  { %v1159_v21 = vpop.f32.mrb[1].mxu0 }
 0x125   :  { %v1160_v22 = vadd.f32 %v1159_v21, %v1158_v24  ;;  %v1193_v34 = vpop.f32.mrb[0].mxu1 }
 0x126   :  { %v1194_v30 = vpop.f32.mrb[1].mxu1 }
 0x127   :  { %v691_v31 = vadd.f32 %v1160_v22, %v1122_v25  ;;  %v1195_v35 = vadd.f32 %v1194_v30, %v1193_v34 }
 0x129   :  { %v761_v37 = vadd.f32 %v1195_v35, %v691_v31 }
 0x147   :  { %v1228_v38 = vpop.f32.mrb[2].mxu0 }
 0x148   :  { %v1229_v40 = vpop.f32.mrb[3].mxu0 }
 0x149   :  { %v1230_v42 = vadd.f32 %v1229_v40, %v1228_v38  ;;  %v1263_v43 = vpop.f32.mrb[2].mxu1 }
 0x14a   :  { %v1264_v44 = vpop.f32.mrb[3].mxu1 }
 0x14b   :  { %v831_v36 = vadd.f32 %v1230_v42, %v761_v37  ;;  %v1265_v46 = vadd.f32 %v1264_v44, %v1263_v43 }
 0x14d   :  { %v901_v47 = vadd.f32 %v1265_v46, %v831_v36 }
 0x167   :  { %v1298_v48 = vpop.f32.mrb[4].mxu0 }
 0x168   :  { %v1299_v41 = vpop.f32.mrb[5].mxu0 }
 0x169   :  { %v1300_v49 = vadd.f32 %v1299_v41, %v1298_v48 }
 0x16b   :  { %v971_v50 = vadd.f32 %v1300_v49, %v901_v47 }
 0x16d   :  { %v974_v51 = vmax.f32 %v971_v50, 0.0 }
 0x16f   :  { %v976_v52 = vsel %vm975_vm4, %v974_v51, 0.0  ;;  %v981_v53 = vmul.f32 %v974_v51, %v974_v51 }
 0x170   :  { %977 = vadd.xlane.f32.xlu0 %v976_v52 }
 0x171   :  { %v982_v55 = vsel %vm975_vm4, %v981_v53, 0.0 }
 0x174   :  { %983 = vadd.xlane.f32.xlu0 %v982_v55 }
 0x1fd   :  { %v978_v12 = vpop.xlane.xlu0 %977 }
 0x1fe   :  { %v980_v28 = vmul.f32 0.0078125, %v978_v12 }
 0x200   :  { %v986_v20 = vmul.f32 %v980_v28, %v980_v28  ;;  %v988_v15 = vsub.f32 %v974_v51, %v980_v28 }
 0x201   :  { %v984_v19 = vpop.xlane.xlu0 %983 }
 0x202   :  { %v985_v33 = vmul.f32 0.0078125, %v984_v19 }
 0x204   :  { %v987_v7 = vsub.f32 %v985_v33, %v986_v20 }
 0x206   :  { %v989_v8 = vadd.f32 1e-05, %v987_v7 }
 0x208   :  { %1545 = vrsqrt.f32 %v989_v8 }
 0x212   :  { %v1546_v39 = vpop.eup %1545 }
 0x213   :  { %v991_v45 = vmul.f32 %v1546_v39, %v988_v15 }
 0x215   :  { %v999_v17 = vmul.f32 %v1123_v16, %v991_v45 }
 0x217   :  { %v1007_v18 = vadd.f32 %v1124_v54, %v999_v17 }
 0x219   :  { %1351 = vmatmul.mubr.f32.vlgmr.msra.gmra.mrb[4].mxu1 %v1007_v18  ;;  %1008 = vst [vmem:[#allocation6] sm:$0x3] %v1007_v18 }
 0x21a   :  { %1580 = shalt.err (!%p1577_p12)
}
 0x21b   :  { %s1581_s26 = scalar_lea.hbm %s1973_s7, 32 }
 0x21c   :  { %p1582_p13 = scmp.ne.s32.totalorder %s1973_s7, %s1581_s26  ;;  %p1585_p0 = scmp.lt.u32.totalorder %s1581_s26, %s1973_s7 }
 0x21e   :  { %p1587_p1 = pnand %p1585_p0, %p1582_p13 }
 0x220   :  { %1590 = shalt.err (!%p1587_p1)
}
 0x221   :  { %1112 = dma.vmem_to_hbm [thread:$0]  %s1110_s23, 32, %s1973_s7, [#allocation5]   ;;  %v1125_v27 = vld [vmem:[%s1972_s6] ss:$0 sm:$0xff] }
 0x2ec   :  { %v1098_v32 = vpop.f32.mrb[4].mxu1 }
 0x2ed   :  { %v1099_v58 = vadd.f32 %v1125_v27, %v1098_v32  ;;  %v1352_v23 = vpop.f32.mrb[5].mxu1 }
 0x2ef   :  { %1102 = vst [vmem:[%s1974_s8] sm:$0x3] %v1099_v58 }
 0x2f0   :  { %1593 = dma.done.wait [#allocation5], 32  }
 0x2f1   :  { %1594 = vsyncadd [#allocation5], 4294967264 }
 0x2f2   :  { %1120 = vsyncpa [#allocation4], 1 }
 0x2f3   :  { %1121 = vsyncpa [#allocation5], 1 }

</bundles_post_ra>
